<compile_context>
chip_gen: v6e
topology: v6e:2x2x1
jax: 0.10.0
libtpu: 0.0.40
codegen_flags: <defaults>
</compile_context>

<pallas_src>
import math
import functools

import jax
import jax.numpy as jnp
import numpy as np
from jax.experimental import pallas as pl
from jax.experimental.pallas import tpu as pltpu


# --------------------------- generation-aware VMEM --------------------------- #

def _vmem_limit_bytes():
    """~55% of physical VMEM (v7x 64 MiB -> ~35 MiB, v5e/v6e 128 MiB -> ~70 MiB)."""
    try:
        cap = pltpu.get_tpu_info().vmem_capacity_bytes
        return max(16 * 1024 * 1024, min(int(cap * 0.55), 100 * 1024 * 1024))
    except Exception:
        return 32 * 1024 * 1024


_VMEM_LIMIT = _vmem_limit_bytes()


# ------------------------------- tile pickers -------------------------------- #

def _pick_lane_tile(dim, max_tile):
    """Largest multiple of 128 dividing `dim` (<= max_tile); else the full dim."""
    t = (min(dim, max_tile) // 128) * 128
    while t >= 128:
        if dim % t == 0:
            return t
        t -= 128
    return dim


def _pick_sublane_tile(dim, max_tile):
    """Largest multiple of 8 dividing `dim` (<= max_tile); else the full dim."""
    t = (min(dim, max_tile) // 8) * 8
    while t >= 8:
        if dim % t == 0:
            return t
        t -= 8
    return dim


# ----------------------------- tiled fused linear ---------------------------- #

def _stacked_linear_kernel(x_ref, w_ref, b_ref, o_ref):
    # x: (tm, tk) f32, w: (1, tk, tn) bf16, b: (1, 1, tn) f32, o: (1, tm, tn) f32
    k = pl.program_id(3)

    @pl.when(k == 0)
    def _():
        o_ref[...] = jnp.zeros_like(o_ref)

    # bf16 MXU operands, f32 accumulation directly into the resident output block.
    o_ref[0] += jnp.dot(x_ref[...].astype(jnp.bfloat16), w_ref[0],
                        preferred_element_type=jnp.float32)

    @pl.when(k == pl.num_programs(3) - 1)
    def _():
        o_ref[0] += b_ref[0]


def stacked_linear(x2d, w_stack, b_stack):
    """y[g] = x2d @ w_stack[g] + b_stack[g].

    x2d: (M, K) f32, w_stack: (G, K, N) bf16, b_stack: (G, 1, N) f32 -> (G, M, N) f32.
    """
    M, K = x2d.shape
    G, _, N = w_stack.shape

    tm = _pick_sublane_tile(M, 512)
    tn = _pick_lane_tile(N, 1024)
    tk = _pick_lane_tile(K, 512)
    grid = (G, M // tm, N // tn, K // tk)

    cost = pl.CostEstimate(
        flops=2 * G * M * N * K,
        transcendentals=0,
        bytes_accessed=4 * M * K + 2 * G * K * N + 4 * G * M * N + 4 * G * N,
    )

    return pl.pallas_call(
        _stacked_linear_kernel,
        out_shape=jax.ShapeDtypeStruct((G, M, N), jnp.float32),
        grid=grid,
        in_specs=[
            pl.BlockSpec((tm, tk), lambda g, i, j, k: (i, k)),
            pl.BlockSpec((1, tk, tn), lambda g, i, j, k: (g, k, j)),
            pl.BlockSpec((1, 1, tn), lambda g, i, j, k: (g, 0, j)),
        ],
        out_specs=pl.BlockSpec((1, tm, tn), lambda g, i, j, k: (g, i, j)),
        compiler_params=pltpu.CompilerParams(
            dimension_semantics=("parallel", "parallel", "parallel", "arbitrary"),
            vmem_limit_bytes=_VMEM_LIMIT,
        ),
        cost_estimate=cost,
    )(x2d, w_stack, b_stack)


# --------------------------------- attention --------------------------------- #

def _softmax_attn_kernel(q_ref, k_ref, v_ref, m_ref, o_ref, *, num_head, head_dim):
    # q_ref: (1, 1, tq, H*hd), k_ref/v_ref: (1, 1, S, H*hd) (resident across q tiles),
    # m_ref: (1, 1, S) f32, o_ref: (1, tq, H*hd) f32
    tq = q_ref.shape[2]
    S = k_ref.shape[2]
    scale = 1.0 / math.sqrt(head_dim)

    # Hoisted key-side additive mask (broadcast once, reused by every head).
    neg = -1000000.0 * (1.0 - m_ref[0])                 # (1, S) f32
    neg_b = jnp.broadcast_to(neg, (tq, S))              # (tq, S) f32

    # Static head loop; every head's result is written straight to its lane slice of
    # o_ref, so per-head intermediates die each iteration (no concat, no carried list).
    for h in range(num_head):
        sl = slice(h * head_dim, (h + 1) * head_dim)
        q = (q_ref[0, 0, :, sl] * scale).astype(jnp.bfloat16)   # (tq, hd)
        k = k_ref[0, 0, :, sl].astype(jnp.bfloat16)             # (S, hd)
        v = v_ref[0, 0, :, sl].astype(jnp.bfloat16)             # (S, hd)

        # scores: contract hd directly (no explicit K transpose); f32 accumulation.
        s = jax.lax.dot_general(q, k, (((1,), (1,)), ((), ())),
                                preferred_element_type=jnp.float32)   # (tq, S)
        s = s + neg_b
        s = s - jnp.max(s, axis=-1, keepdims=True)
        p = jnp.exp(s)                                            # (tq, S) f32
        denom = jnp.sum(p, axis=-1, keepdims=True)                # (tq, 1) f32

        # Normalize AFTER the PV matmul: tq*hd muls instead of tq*S.
        o_h = jnp.dot(p.astype(jnp.bfloat16), v,
                      preferred_element_type=jnp.float32)         # (tq, hd) f32
        o_ref[0, :, sl] = o_h * pl.reciprocal(denom, approx=True)


def softmax_attention(qkv, mask, *, num_head, head_dim):
    """qkv: (3, B, S, H*hd) f32; mask: (B, S) -> (B, S, H*hd) f32."""
    _, B, S, inner = qkv.shape
    mask3 = mask.reshape(B, 1, S).astype(jnp.float32)

    tq = _pick_sublane_tile(S, 256)
    grid = (B, S // tq)

    kernel = functools.partial(_softmax_attn_kernel,
                               num_head=num_head, head_dim=head_dim)
    cost = pl.CostEstimate(
        flops=4 * B * num_head * S * S * head_dim,
        transcendentals=B * num_head * S * S,
        bytes_accessed=4 * (3 * B * S * inner + B * S + B * S * inner),
    )

    return pl.pallas_call(
        kernel,
        out_shape=jax.ShapeDtypeStruct((B, S, inner), jnp.float32),
        grid=grid,
        in_specs=[
            # Same stacked array passed three times; first-axis block index selects
            # Q / K / V.  K and V index maps ignore the q axis -> stay resident.
            pl.BlockSpec((1, 1, tq, inner), lambda b, qi: (0, b, qi, 0)),
            pl.BlockSpec((1, 1, S, inner), lambda b, qi: (1, b, 0, 0)),
            pl.BlockSpec((1, 1, S, inner), lambda b, qi: (2, b, 0, 0)),
            pl.BlockSpec((1, 1, S), lambda b, qi: (b, 0, 0)),
        ],
        out_specs=pl.BlockSpec((1, tq, inner), lambda b, qi: (b, qi, 0)),
        compiler_params=pltpu.CompilerParams(
            dimension_semantics=("parallel", "parallel"),
            vmem_limit_bytes=_VMEM_LIMIT,
        ),
        cost_estimate=cost,
    )(qkv, qkv, qkv, mask3)


# ------------------------------ module wrapper -------------------------------- #

class AttentionPallas:
    """Mirrors lpzero Attention(config) with attn_type='softmax', eval mode."""

    def __init__(self, dim, num_head, head_dim, key):
        self.dim = dim
        self.num_head = num_head
        self.head_dim = head_dim
        inner = num_head * head_dim

        k = jax.random.split(key, 8)
        scale_in = 1.0 / math.sqrt(dim)
        scale_inner = 1.0 / math.sqrt(inner)
        # weights stored as (in, out); PyTorch nn.Linear weight is (out, in)
        self.W_q = jax.random.uniform(k[0], (dim, inner), jnp.float32, -scale_in, scale_in)
        self.b_q = jax.random.uniform(k[1], (inner,), jnp.float32, -scale_in, scale_in)
        self.W_k = jax.random.uniform(k[2], (dim, inner), jnp.float32, -scale_in, scale_in)
        self.b_k = jax.random.uniform(k[3], (inner,), jnp.float32, -scale_in, scale_in)
        self.W_v = jax.random.uniform(k[4], (dim, inner), jnp.float32, -scale_in, scale_in)
        self.b_v = jax.random.uniform(k[5], (inner,), jnp.float32, -scale_in, scale_in)
        self.W_ff = jax.random.uniform(k[6], (inner, dim), jnp.float32, -scale_inner, scale_inner)
        self.b_ff = jax.random.uniform(k[7], (dim,), jnp.float32, -scale_inner, scale_inner)

        # Fused / stacked parameters used by the Pallas kernels (weights in bf16 for
        # the MXU; biases and accumulation stay f32).
        self.W_qkv = jnp.stack([self.W_q, self.W_k, self.W_v], axis=0).astype(jnp.bfloat16)
        self.b_qkv = jnp.stack([self.b_q, self.b_k, self.b_v], axis=0)[:, None]   # (3,1,inner) f32
        self.W_ff_s = self.W_ff[None].astype(jnp.bfloat16)                        # (1, inner, D)
        self.b_ff_s = self.b_ff.reshape(1, 1, dim)                                # (1, 1, D) f32

    def __call__(self, X, mask):
        B, S, D = X.shape
        inner = self.num_head * self.head_dim
        x2d = X.reshape(B * S, D).astype(jnp.float32)

        # Fused Q/K/V projection: one kernel, X read once.
        qkv = stacked_linear(x2d, self.W_qkv, self.b_qkv)      # (3, B*S, inner) f32
        qkv = qkv.reshape(3, B, S, inner)                      # free contiguous reshape

        # Attention: Q-row tiled, K/V resident per batch element, lane-dense output.
        attn_out = softmax_attention(qkv, mask,
                                     num_head=self.num_head,
                                     head_dim=self.head_dim)   # (B, S, inner)

        # Output projection.
        out = stacked_linear(attn_out.reshape(B * S, inner),
                             self.W_ff_s, self.b_ff_s)[0]      # (B*S, D)
        return out.reshape(B, S, D)


# -------------------------------- reference ----------------------------------- #

def reference_forward(mod: AttentionPallas, X, mask):
    B, S, D = X.shape
    H, hd = mod.num_head, mod.head_dim
    x2d = X.reshape(B * S, D)
    Q = (x2d @ mod.W_q + mod.b_q).reshape(B, S, H, hd).transpose(0, 2, 1, 3)
    K = (x2d @ mod.W_k + mod.b_k).reshape(B, S, H, hd).transpose(0, 2, 1, 3)
    V = (x2d @ mod.W_v + mod.b_v).reshape(B, S, H, hd).transpose(0, 2, 1, 3)
    dot = jnp.einsum("bhqd,bhkd->bhqk", Q, K) / math.sqrt(hd)
    dot = dot - 1000000.0 * (1.0 - mask[:, None, None, :])
    attn = jax.nn.softmax(dot, axis=-1)
    Xo = jnp.einsum("bhqk,bhkd->bhqd", attn, V)
    Xo = Xo.transpose(0, 2, 1, 3).reshape(B, S, H * hd)
    return (Xo.reshape(B * S, -1) @ mod.W_ff + mod.b_ff).reshape(B, S, mod.dim)


# ---------------------------------- main --------------------------------------- #

if __name__ == "__main__":
    B, S, D = 2, 8, 32
    num_head, head_dim = 2, 16

    key = jax.random.PRNGKey(0)
    k_x, k_m, k_p = jax.random.split(key, 3)

    X = jax.random.normal(k_x, (B, S, D), jnp.float32)
    # mask: 1 = attend, 0 = masked; ensure at least first positions are kept
    mask = (jax.random.uniform(k_m, (B, S)) > 0.3).astype(jnp.float32)
    mask = mask.at[:, 0].set(1.0)

    module = AttentionPallas(D, num_head, head_dim, k_p)

    out = module(X, mask)
    out = jax.block_until_ready(out)

    ref = reference_forward(module, X, mask)
    # tolerance covers bf16 MXU operands + approx (EUP) reciprocal in the softmax denom
    np.testing.assert_allclose(np.asarray(out), np.asarray(ref), rtol=3e-2, atol=3e-2)

    print("KERNEL_OK")
</pallas_src>

<mosaic_0001>
module attributes {stable_mosaic.version = 11 : i64} {
  func.func @_stacked_linear_kernel(%arg0: i32, %arg1: i32, %arg2: i32, %arg3: i32, %arg4: memref<16x32xf32, #tpu.memory_space<vmem>>, %arg5: memref<1x32x32xbf16, #tpu.memory_space<vmem>>, %arg6: memref<1x1x32xf32, #tpu.memory_space<vmem>>, %arg7: memref<1x16x32xf32, #tpu.memory_space<vmem>>) attributes {dimension_semantics = [#tpu.dimension_semantics<parallel>, #tpu.dimension_semantics<parallel>, #tpu.dimension_semantics<parallel>, #tpu.dimension_semantics<arbitrary>], iteration_bounds = array<i64: 3, 1, 1, 1>, scalar_prefetch = 0 : i64, scratch_operands = 0 : i64, tpu.core_type = #tpu.core_type<tc>, window_params = [{transform_indices = @transform_0, window_bounds = array<i64: 16, 32>}, {transform_indices = @transform_1, window_bounds = array<i64: 1, 32, 32>}, {transform_indices = @transform_2, window_bounds = array<i64: 1, 1, 32>}, {transform_indices = @transform_3, window_bounds = array<i64: 1, 16, 32>}]} {
    %c0_i32 = arith.constant 0 : i32
    %0 = arith.cmpi eq, %arg3, %c0_i32 : i32
    %1 = arith.extui %0 : i1 to i32
    %c0_i32_0 = arith.constant 0 : i32
    %2 = arith.cmpi ne, %1, %c0_i32_0 : i32
    scf.if %2 {
      %cst_13 = arith.constant 0.000000e+00 : f32
      %17 = vector.broadcast %cst_13 : f32 to vector<1x16x32xf32>
      %c0_14 = arith.constant 0 : index
      %c0_15 = arith.constant 0 : index
      %c0_16 = arith.constant 0 : index
      %18 = vector.load %arg7[%c0_14, %c0_15, %c0_16] : memref<1x16x32xf32, #tpu.memory_space<vmem>>, vector<1x16x32xf32>
      tpu.vector_store %arg7[%c0_14, %c0_15, %c0_16], %17 {strides = array<i32>} : memref<1x16x32xf32, #tpu.memory_space<vmem>>, vector<1x16x32xf32>,
    } else {
    }
    %c0 = arith.constant 0 : index
    %c0_1 = arith.constant 0 : index
    %c0_2 = arith.constant 0 : index
    %3 = vector.load %arg7[%c0, %c0_1, %c0_2] : memref<1x16x32xf32, #tpu.memory_space<vmem>>, vector<1x16x32xf32>
    %4 = vector.shape_cast %3 : vector<1x16x32xf32> to vector<16x32xf32>
    %c0_3 = arith.constant 0 : index
    %c0_4 = arith.constant 0 : index
    %5 = vector.load %arg4[%c0_3, %c0_4] : memref<16x32xf32, #tpu.memory_space<vmem>>, vector<16x32xf32>
    %6 = arith.truncf %5 : vector<16x32xf32> to vector<16x32xbf16>
    %c0_5 = arith.constant 0 : index
    %c0_6 = arith.constant 0 : index
    %c0_7 = arith.constant 0 : index
    %7 = vector.load %arg5[%c0_5, %c0_6, %c0_7] : memref<1x32x32xbf16, #tpu.memory_space<vmem>>, vector<1x32x32xbf16>
    %8 = vector.shape_cast %7 : vector<1x32x32xbf16> to vector<32x32xbf16>
    %cst = arith.constant dense<0.000000e+00> : vector<16x32xf32>
    %9 = tpu.matmul %6, %8, %cst {dimension_numbers = #tpu.dot_dimension_numbers<[1], [0], [0], [1], [0, 0, 1, 1], [], []>} : vector<16x32xbf16>, vector<32x32xbf16>, vector<16x32xf32> -> vector<16x32xf32>
    %10 = arith.addf %4, %9 : vector<16x32xf32>
    %c0_8 = arith.constant 0 : index
    %c0_9 = arith.constant 0 : index
    %c0_10 = arith.constant 0 : index
    %11 = vector.load %arg7[%c0_8, %c0_9, %c0_10] : memref<1x16x32xf32, #tpu.memory_space<vmem>>, vector<1x16x32xf32>
    %12 = vector.shape_cast %11 : vector<1x16x32xf32> to vector<16x32xf32>
    %13 = vector.shape_cast %10 : vector<16x32xf32> to vector<1x16x32xf32>
    tpu.vector_store %arg7[%c0_8, %c0_9, %c0_10], %13 {strides = array<i32>} : memref<1x16x32xf32, #tpu.memory_space<vmem>>, vector<1x16x32xf32>,
    %c0_i32_11 = arith.constant 0 : i32
    %14 = arith.cmpi eq, %arg3, %c0_i32_11 : i32
    %15 = arith.extui %14 : i1 to i32
    %c0_i32_12 = arith.constant 0 : i32
    %16 = arith.cmpi ne, %15, %c0_i32_12 : i32
    scf.if %16 {
      %c0_13 = arith.constant 0 : index
      %c0_14 = arith.constant 0 : index
      %c0_15 = arith.constant 0 : index
      %17 = vector.load %arg7[%c0_13, %c0_14, %c0_15] : memref<1x16x32xf32, #tpu.memory_space<vmem>>, vector<1x16x32xf32>
      %18 = vector.shape_cast %17 : vector<1x16x32xf32> to vector<16x32xf32>
      %c0_16 = arith.constant 0 : index
      %c0_17 = arith.constant 0 : index
      %c0_18 = arith.constant 0 : index
      %19 = vector.load %arg6[%c0_16, %c0_17, %c0_18] : memref<1x1x32xf32, #tpu.memory_space<vmem>>, vector<1x1x32xf32>
      %20 = vector.shape_cast %19 : vector<1x1x32xf32> to vector<1x32xf32>
      %21 = vector.broadcast %20 : vector<1x32xf32> to vector<16x32xf32>
      %22 = arith.addf %18, %21 : vector<16x32xf32>
      %c0_19 = arith.constant 0 : index
      %c0_20 = arith.constant 0 : index
      %c0_21 = arith.constant 0 : index
      %23 = vector.load %arg7[%c0_19, %c0_20, %c0_21] : memref<1x16x32xf32, #tpu.memory_space<vmem>>, vector<1x16x32xf32>
      %24 = vector.shape_cast %23 : vector<1x16x32xf32> to vector<16x32xf32>
      %25 = vector.shape_cast %22 : vector<16x32xf32> to vector<1x16x32xf32>
      tpu.vector_store %arg7[%c0_19, %c0_20, %c0_21], %25 {strides = array<i32>} : memref<1x16x32xf32, #tpu.memory_space<vmem>>, vector<1x16x32xf32>,
    } else {
    }
    return
  }
  func.func @transform_0(%arg0: i32, %arg1: i32, %arg2: i32, %arg3: i32) -> (i32, i32) {
    %c0_i32 = arith.constant 0 : i32
    return %arg1, %arg3 : i32, i32
  }
  func.func @transform_1(%arg0: i32, %arg1: i32, %arg2: i32, %arg3: i32) -> (i32, i32, i32) {
    %c0_i32 = arith.constant 0 : i32
    return %arg0, %arg3, %arg2 : i32, i32, i32
  }
  func.func @transform_2(%arg0: i32, %arg1: i32, %arg2: i32, %arg3: i32) -> (i32, i32, i32) {
    %c0_i32 = arith.constant 0 : i32
    %c0_i32_0 = arith.constant 0 : i32
    return %arg0, %c0_i32, %arg2 : i32, i32, i32
  }
  func.func @transform_3(%arg0: i32, %arg1: i32, %arg2: i32, %arg3: i32) -> (i32, i32, i32) {
    %c0_i32 = arith.constant 0 : i32
    return %arg0, %arg1, %arg2 : i32, i32, i32
  }
}

</mosaic_0001>

<bundles_post_ra>
// kernel: tpu_custom_call.1
= control target key start
LH: loop header
LB: loop body
LE: loop exit
PB: predicated region body
PF: predicated region fallthrough
CT: control target
= control target key end

     0   :  { %8 = vsyncpa [#allocation3], 0  ;;  %s1006_s0 = inlined_call_operand.hbm [shape: f32[16,32], index: 0, kind: input, shape index: {}]   ;;  %s1007_s1 = inlined_call_operand.hbm [shape: bf16[3,32,32], index: 1, kind: input, shape index: {}]   ;;  %s1008_s2 = inlined_call_operand.vmem [shape: f32[3,1,32], index: 2, kind: input, shape index: {}]   ;;  %s1009_s3 = inlined_call_operand.hbm [shape: f32[3,16,32], index: 3, kind: output, shape index: {}]  }
   0x1   :  { %9 = vsyncpa [#allocation6], 0 }
   0x2   :  { %11 = vsyncpa [#allocation6 + $0x1], 0 }
   0x3   :  { %12 = vsyncpa [#allocation4], 0 }
   0x4   :  { %14 = vsyncpa [#allocation4 + $0x1], 0  ;;  %s802_s12 = smov 0   ;;  %s804_s13 = smov 0  }
   0x5   :  { %s806_s14 = smov 0   ;;  %s808_s15 = smov 0  }
   0x6   :  { %s810_s16 = smov 0   ;;  %s812_s17 = smov 0  }
   0x7 LB: > { %s514_s18 = sadd.s32 4294967295, %s769_s17   ;;  %s515_s19 = sadd.s32 4294967294, %s769_s17   ;;  %s769_s17 = sphi %s812_s17, %s20_s17   ;;  %s765_s16 = sphi %s810_s16, %s1026_s16   ;;  %s761_s15 = sphi %s808_s15, %s1025_s15   ;;  %s757_s14 = sphi %s806_s14, %s1024_s14   ;;  %s753_s13 = sphi %s804_s13, %s1023_s13   ;;  %s749_s12 = sphi %s802_s12, %s1022_s12  }
   0x8   : > { %p98_p0 = scmp.ne.s32.totalorder %s753_s13, %s749_s12  ;;  %p836_p1 = scmp.eq.s32.totalorder %s514_s18, 0 }
   0x9   : > { %p840_p2 = scmp.eq.s32.totalorder %s514_s18, 2  ;;  %p160_p3 = scmp.eq.s32.totalorder %s515_s19, 2 }
   0xa   : > { %p846_p4 = por %p836_p1, %p98_p0  ;;  %p516_p5 = scmp.ge.s32.totalorder %s769_s17, 1 }
   0xb   : > { %p851_p6 = por %p160_p3, %p98_p0  ;;  %p167_p7 = scmp.lt.s32.totalorder %s769_s17, 4 }
   0xc   : > { %s771_s25 = smov [#allocation2]   ;;  %s46_s28 = sadd.s32 1, %s765_s16 }
   0xd   : > { %s1014_s23 = scalar_select %p851_p6, 1, 0 }
   0xe   : > { %p856_p8 = pnand %p516_p5, %p167_p7  ;;  %s183_s26 = sshll.u32 %s771_s25, 4  ;;  %s184_s26 = int_to_ptr.vmem [resolvable:$true] %s183_s26 }
   0xf   : > { %s642_s29 = scalar_lea.vmem %s184_s26, 256  ;;  %p650_p3 = scmp.lt.s32.totalorder %s184_s26, %s184_s26 }
  0x10   : > { %p556_p9 = pneg %p856_p8  ;;  %p643_p12 = scmp.ne.s32.totalorder %s184_s26, %s642_s29 }
  0x11   : > { %p651_p5 = scmp.lt.s32.totalorder %s642_s29, %s642_s29 }
  0x12   : > { %p864_p10 = pnand %p556_p9, %p836_p1 }
  0x13   : > { %p652_p7 = por %p651_p5, %p650_p3 }
  0x14   : > { %p633_p11 = pneg %p864_p10 }
  0x16   : > { %p645_p13 = pnand %p643_p12, %p633_p11 }
  0x18   : > { %p646_p0 = pneg %p645_p13 }
  0x1a   : > { %p653_p6 = pnand %p652_p7, %p646_p0 }
  0x1c   : > { %656 = shalt.err (!%p653_p6)
}
  0x1d   : > { %s772_s30 = smov 128   ;;  %s773_s4 = smov 8  }
  0x1e   : > { %559 = dma.hbm_to_vmem [thread:$0]  (!%p864_p10), %s1006_s0, 256, %s184_s26, [#allocation3], %s772_s30, %s772_s30, %s773_s4  }
  0x1f   : > { %p48_p9 = scmp.ge.s32.totalorder %s46_s28, 3  ;;  %s85_s7 = sadd.s32 1, %s757_s14 }
  0x20   : > { %p92_p6 = scmp.ne.s32.totalorder %s757_s14, %s753_s13  ;;  %p93_p11 = scmp.eq.s32.totalorder %s769_s17, 0 }
  0x21   : > { %s1028_s28 = smov (%p48_p9, %s46_s28), 0  ;;  %p569_p0 = scmp.lt.s32.totalorder %s769_s17, 3 }
  0x22   : > { %p882_p12 = por %p93_p11, %p92_p6  ;;  %p888_p13 = por %p840_p2, %p92_p6 }
  0x23   : > { %s78_s10 = ssub.s32 %s765_s16, %s1028_s28  ;;  %s197_s11 = sand.u32 1, %s757_s14  }
  0x24   : > { %s1018_s9 = scalar_select %p888_p13, 1, 0 }
  0x25   : > { %p83_p10 = scmp.eq.s32.totalorder %s78_s10, 0  ;;  %s519_s18 = sshll.u32 %s197_s11, 4 }
  0x26   : > { %s535_s25 = sshll.u32 %s765_s16, 8  ;;  %s201_s30 = scalar_lea.vmem [#allocation5], %s519_s18 }
  0x27   : > { %s897_s19 = scalar_select %p83_p10, %s757_s14, %s85_s7  }
  0x28   : > { %s210_s29 = scalar_lea.hbm %s1007_s1, %s535_s25  ;;  %s211_s4 = sshll.u32 %s201_s30, 4  ;;  %s212_s4 = int_to_ptr.vmem [resolvable:$true] %s211_s4 }
  0x29   : > { %p905_p2 = pnand %p569_p0, %p882_p12  ;;  %s198_s5 = scalar_lea.sflag [#allocation6], %s197_s11 }
  0x2a   : > { %s670_s6 = scalar_lea.vmem %s212_s4, 256  ;;  %s774_s7 = smov [#allocation5]  }
  0x2b   : > { %p659_p3 = pneg %p905_p2  ;;  %p671_p5 = scmp.ne.s32.totalorder %s212_s4, %s670_s6 }
  0x2c   : > { %s675_s10 = sshll.u32 %s774_s7, 4  ;;  %s676_s10 = int_to_ptr.vmem [resolvable:$false] %s675_s10 }
  0x2d   : > { %p673_p7 = pnand %p671_p5, %p659_p3  ;;  %s677_s25 = scalar_lea.vmem %s676_s10, 512 }
  0x2e   : > { %p678_p6 = scmp.lt.s32.totalorder %s212_s4, %s676_s10  ;;  %p679_p11 = scmp.lt.s32.totalorder %s677_s25, %s670_s6 }
  0x2f   : > { %p674_p9 = pneg %p673_p7 }
  0x30   : > { %p680_p10 = por %p679_p11, %p678_p6 }
  0x32   : > { %p681_p13 = pnand %p680_p10, %p674_p9 }
  0x34   : > { %684 = shalt.err (!%p681_p13)
}
  0x35   : > { %s775_s8 = smov 64   ;;  %s776_s18 = smov 4  }
  0x36   : > { %563 = dma.hbm_to_vmem [thread:$0]  (!%p905_p2), %s210_s29, 256, %s212_s4, %s198_s5, %s775_s8, %s775_s8, %s776_s18  }
  0x37   : > { %232 = sbr.rel (%p856_p8) target bundleno = 297 (0x129), region = 32 }
  0x3c   : > { %736 = dma.done.wait (%p836_p1), [#allocation3], 256  }
  0x3d   : > { %738 = vsyncadd (%p836_p1), [#allocation3], 4294967040  ;;  %s920_s11 = sand.u32 1, %s753_s13  }
  0x3e   : > { %s524_s26 = sshll.u32 %s920_s11, 4  ;;  %s239_s27 = scalar_lea.sflag [#allocation6], %s920_s11 }
  0x3f   : > { %s242_s30 = scalar_lea.vmem [#allocation5], %s524_s26 }
  0x40   : > { %740 = dma.done.wait (%p846_p4), %s239_s27, 256  }
  0x41   : > { %742 = vsyncadd (%p846_p4), %s239_s27, 4294967040  ;;  %vm285_vm0 = vcmask 261120   ;;  %v777_v0 = vmov 0.0   ;;  %vm778_vm1 = vmmov 0   ;;  %s928_s20 = scalar_lea.vmem [#allocation7], %s524_s26  ;;  %v629_v1 = vld [vmem:[%s242_s30 + $0x8] sm:$0xff]  }
  0x42   : > { %540 = vmatprep.subr.bf16.mxu0 %v777_v0  ;;  %544 = vmatprep.mubr.msk.bf16.mxu0 %vm778_vm1, %v777_v0  ;;  %286 = vst.msk [vmem:[%s928_s20] sm:$0xff] %vm285_vm0, %v777_v0  ;;  %287 = vst.msk [vmem:[%s928_s20 + $0x8] sm:$0xff] %vm285_vm0, %v777_v0  ;;  %v630_v2 = vld [vmem:[%s242_s30] sm:$0xff]   ;;  %v291_v4 = vld [vmem:[#allocation2 + $0x8] sm:$0xff]  ;;  %p273_p1 = scmp.lt.s32.totalorder %s761_s15, 2  ;;  %s536_s21 = sshll.u32 %s761_s15, 8 }
  0x43   : > { %541 = vmatpush3.bf16.msra.mxu0 %v629_v1  ;;  %v290_v3 = vld [vmem:[#allocation2] sm:$0xff]  ;;  %s391_s5 = sshll.u32 %s928_s20, 4  ;;  %s955_s10 = scalar_lea.hbm %s1009_s3, %s536_s21  ;;  %s957_s5 = int_to_ptr.vmem [resolvable:$true] %s391_s5 }
  0x44   : > { %542 = vmatprep.subr.bf16.mxu0 %v777_v0  ;;  %v292_v5 = vpack.c.bf16 %v291_v4, %v290_v3  ;;  %s274_s22 = scalar_select %p273_p1, %s761_s15, 2 }
  0x45   : > { %s375_s25 = scalar_lea.sflag [#allocation4], %s920_s11  ;;  %s685_s8 = scalar_lea.vmem %s957_s5, 256 }
  0x46   : > { %s278_s4 = scalar_lea.vmem %s1008_s2, %s274_s22  ;;  %p686_p4 = scmp.ne.s32.totalorder %s957_s5, %s685_s8 }
  0x47   : > { %543 = vmatpush3.bf16.msra.mxu0 %v630_v2  ;;  %v529_v14 = vld [vmem:[%s278_s4] ss:$0 sm:$0xff]  ;;  %p1020_p8 = scmp.ne.s32.totalorder %s1018_s9, 0  ;;  %s779_s15 = smov [#allocation7]  }
  0x48   : > { %s689_s18 = sshll.u32 %s779_s15, 4  ;;  %s690_s18 = int_to_ptr.vmem [resolvable:$false] %s689_s18 }
  0x49   : > { %v288_v6 = vld [vmem:[%s928_s20] sm:$0xff]  ;;  %v289_v10 = vld [vmem:[%s928_s20 + $0x8] sm:$0xff]  ;;  %p687_p12 = pnand %p686_p4, %p1020_p8  ;;  %s691_s26 = scalar_lea.vmem %s690_s18, 512 }
  0x4a   : > { %545 = vmatmul.mubr.msk.bf16.vlgmr.msra.gmra.mxu0 %vm285_vm0, %v292_v5  ;;  %p692_p0 = scmp.lt.s32.totalorder %s957_s5, %s690_s18  ;;  %p693_p2 = scmp.lt.s32.totalorder %s691_s26, %s685_s8 }
  0x4b   : > { %p688_p13 = pneg %p687_p12 }
  0x4c   : > { %p694_p3 = por %p693_p2, %p692_p0 }
  0x4e   : > { %p695_p5 = pnand %p694_p3, %p688_p13 }
 0x10a   : > { %v347_v7 = vpop.f32.mrf.mxu0 }
 0x10b   : > { %v354_v8 = vadd.f32 %v347_v7, %v288_v6 }
 0x10c   : > { %v546_v9 = vpop.f32.mrf.mxu0 }
 0x10d   : > { %356 = vst.msk [vmem:[%s928_s20] sm:$0xff] %vm285_vm0, %v354_v8 }
 0x10e   : > { %v350_v11 = vpop.f32.mrf.mxu0 }
 0x10f   : > { %v355_v12 = vadd.f32 %v350_v11, %v289_v10 }
 0x110   : > { %v547_v13 = vpop.f32.mrf.mxu0 }
 0x111   : > { %357 = vst.msk [vmem:[%s928_s20 + $0x8] sm:$0xff] %vm285_vm0, %v355_v12 }
 0x114   : > { %v361_v15 = vld [vmem:[%s928_s20] sm:$0xff] }
 0x115   : > { %v370_v16 = vadd.f32 %v529_v14, %v361_v15 }
 0x117   : > { %372 = vst.msk [vmem:[%s928_s20] sm:$0xff] %vm285_vm0, %v370_v16 }
 0x118   : > { %v362_v17 = vld [vmem:[%s928_s20 + $0x8] sm:$0xff] }
 0x119   : > { %v371_v18 = vadd.f32 %v529_v14, %v362_v17 }
 0x11b   : > { %373 = vst.msk [vmem:[%s928_s20 + $0x8] sm:$0xff] %vm285_vm0, %v371_v18 }
 0x11c   : > { %698 = shalt.err (!%p695_p5)
}
 0x11d   : > { %s699_s27 = scalar_lea.hbm %s955_s10, 256  ;;  %s703_s22 = scalar_lea.hbm %s1009_s3, 768 }
 0x11e   : > { %p700_p7 = scmp.ne.s32.totalorder %s955_s10, %s699_s27  ;;  %p704_p11 = scmp.lt.s32.totalorder %s955_s10, %s1009_s3 }
 0x11f   : > { %p705_p10 = scmp.lt.s32.totalorder %s703_s22, %s699_s27 }
 0x120   : > { %p701_p9 = pnand %p700_p7, %p1020_p8 }
 0x121   : > { %p706_p1 = por %p705_p10, %p704_p11 }
 0x122   : > { %p702_p6 = pneg %p701_p9 }
 0x124   : > { %p707_p4 = pnand %p706_p1, %p702_p6 }
 0x126   : > { %710 = shalt.err (!%p707_p4)
}
 0x127   : > { %s780_s4 = smov 128   ;;  %s781_s21 = smov 8  }
 0x128   : > { %554 = dma.vmem_to_hbm [thread:$0]  (%p1020_p8), %s957_s5, 256, %s955_s10, %s375_s25, %s780_s4, %s780_s4, %s781_s21  }
 0x129 PF: > { %p571_p12 = scmp.ge.s32.totalorder %s769_s17, 2  ;;  %s406_s6 = sand.u32 1, %s749_s12  }
 0x12a   : > { %p1021_p13 = scmp.ne.s32.totalorder %s1014_s23, 0  ;;  %s407_s7 = scalar_lea.sflag [#allocation4], %s406_s6 }
 0x12c   : > { %p565_p0 = pnand %p571_p12, %p1021_p13 }
 0x12e   : > { %p566_p2 = pneg %p565_p0 }
 0x130   : > { %744 = dma.done.wait (%p566_p2), %s407_s7, 256  }
 0x131   : > { %746 = vsyncadd (%p566_p2), %s407_s7, 4294967040  ;;  %s20_s17 = sadd.s32 1, %s769_s17   ;;  %s1022_s12 = smov %s753_s13 }
 0x132   : > { %p17_p3 = scmp.ge.s32.totalorder %s20_s17, 5   ;;  %s1023_s13 = smov %s757_s14 }
 0x133   : > { %s1024_s14 = smov %s897_s19  ;;  %s1025_s15 = smov %s765_s16 }
 0x134   : > { %s1026_s16 = smov %s1028_s28  ;;  %19 = sbr.rel (!%p17_p3) target bundleno = 7 (0x7), region = 94 }
 0x139   :  { %412 = vsyncpa [#allocation3], 1 }
 0x13a   :  { %414 = vsyncpa [#allocation3 + $0x1], 1 }
 0x13b   :  { %415 = vsyncpa [#allocation6], 1 }
 0x13c   :  { %417 = vsyncpa [#allocation6 + $0x1], 1 }
 0x13d   :  { %418 = vsyncpa [#allocation4], 1 }
 0x13e   :  { %420 = vsyncpa [#allocation4 + $0x1], 1 }

</bundles_post_ra>
